<compile_context>
chip_gen: v6e
topology: v6e:2x2x1
jax: 0.10.0
libtpu: 0.0.40
codegen_flags: <defaults>
</compile_context>

<pallas_src>
import jax
import jax.numpy as jnp
import numpy as np
from jax import lax
from jax.experimental import pallas as pl
from jax.experimental.pallas import tpu as pltpu

LN_EPS = 1e-5  # PyTorch nn.LayerNorm default


def attn_decoder_kernel(qT_ref, k_ref, v_ref, kwe_ref, kb_ref, vw_ref,
                        g2_ref, b2_ref, out_ref):
    bt, m, c = k_ref.shape          # [Bt, M, C]
    _, c0, n = qT_ref.shape         # [Bt, C0, N]   (N on lanes)
    f32 = jnp.float32
    mx_dt = k_ref.dtype             # MXU operand dtype = input dtype

    # ---- norm1(key) (affine folded into kwe/kb) + both projections,
    #      flattened over all Bt*M key/value rows (one matmul each).
    k2 = k_ref[...].reshape(bt * m, c).astype(f32)
    mu = jnp.mean(k2, axis=-1, keepdims=True)
    var = jnp.mean(jnp.square(k2 - mu), axis=-1, keepdims=True)
    kn = (k2 - mu) * lax.rsqrt(var + LN_EPS)                       # [Bt*M, C]

    kp = jnp.dot(kn.astype(mx_dt), kwe_ref[...],
                 preferred_element_type=f32) + kb_ref[...].astype(f32)   # [Bt*M, C0]
    vp = jnp.dot(v_ref[...].reshape(bt * m, c), vw_ref[...],
                 preferred_element_type=f32)                              # [Bt*M, C0]

    g2 = g2_ref[...].astype(f32)    # [C0, 1]
    b2 = b2_ref[...].astype(f32)    # [C0, 1]

    # Static per-batch loop over the block; every intermediate is 2-D with the
    # large N dimension on the lane axis.
    for b in range(bt):
        # ---- norm2(query) over C0 (sublane axis); N stays lane-dense.
        qb = qT_ref[b].astype(f32)                                  # [C0, N]
        mu_q = jnp.mean(qb, axis=0, keepdims=True)                  # [1, N]
        var_q = jnp.mean(jnp.square(qb - mu_q), axis=0, keepdims=True)
        qn = (qb - mu_q) * lax.rsqrt(var_q + LN_EPS) * g2 + b2      # [C0, N]

        kp_b = kp[b * m:(b + 1) * m]                                # [M, C0]
        vp_b = vp[b * m:(b + 1) * m]                                # [M, C0]

        # attn^T[m, n] = sum_{c0} kp_b[m, c0] * qn[c0, n]   (== attn[n, m])
        s = jnp.dot(kp_b.astype(mx_dt), qn.astype(qT_ref.dtype),
                    preferred_element_type=f32)                     # [M, N]

        # softmax over M (sublane reduction; N lane-dense)
        s = s - jnp.max(s, axis=0, keepdims=True)
        e = jnp.exp(s)
        p = e * pl.reciprocal(jnp.sum(e, axis=0, keepdims=True), approx=True)

        # out^T[c0, n] = sum_m vp_b[m, c0] * p[m, n]
        o = lax.dot_general(vp_b.astype(mx_dt), p.astype(mx_dt),
                            dimension_numbers=(((0,), (0,)), ((), ())),
                            preferred_element_type=f32)             # [C0, N]
        out_ref[b] = o.astype(out_ref.dtype)


def attn_decoder_block(query, key, value, k_w, v_w, g1, b1, g2, b2,
                       *, batch_block=None):
    B, N, C0 = query.shape
    _, M, C = key.shape
    assert key.shape == (B, M, C) and value.shape == (B, M, C)
    assert k_w.shape == (C, C0) and v_w.shape == (C, C0)

    if batch_block is None:
        # Keep >= 2 grid steps when B >= 2 so both v7x TensorCores get work;
        # otherwise pack as many batches per step as possible.
        batch_block = max(1, B // 2)
    assert B % batch_block == 0
    grid = (B // batch_block,)

    # --- wrapper-side layout plumbing (lane-dense kernel views) -------------
    qT = jnp.transpose(query, (0, 2, 1))            # [B, C0, N]  (N on lanes)
    g2c = jnp.reshape(g2, (C0, 1))                  # column vectors broadcast
    b2c = jnp.reshape(b2, (C0, 1))                  #   over [C0, N]

    # Fold norm1's affine into the key projection: LN(k) @ W
    #   = ((k - mu)/s) @ (diag(g1) @ W) + b1 @ W
    g1v = jnp.reshape(g1, (C,))
    b1v = jnp.reshape(b1, (1, C))
    k_w_eff = k_w * g1v[:, None]                    # [C, C0]
    k_bias = b1v @ k_w                              # [1, C0]

    out_t = pl.pallas_call(
        attn_decoder_kernel,
        out_shape=jax.ShapeDtypeStruct((B, C0, N), query.dtype),
        grid_spec=pltpu.PrefetchScalarGridSpec(
            num_scalar_prefetch=0,
            grid=grid,
            in_specs=[
                pl.BlockSpec((batch_block, C0, N), lambda b: (b, 0, 0)),  # query^T
                pl.BlockSpec((batch_block, M, C), lambda b: (b, 0, 0)),   # key
                pl.BlockSpec((batch_block, M, C), lambda b: (b, 0, 0)),   # value
                pl.BlockSpec((C, C0), lambda b: (0, 0)),                  # k_w_eff
                pl.BlockSpec((1, C0), lambda b: (0, 0)),                  # k_bias
                pl.BlockSpec((C, C0), lambda b: (0, 0)),                  # v_w
                pl.BlockSpec((C0, 1), lambda b: (0, 0)),                  # norm2 gamma
                pl.BlockSpec((C0, 1), lambda b: (0, 0)),                  # norm2 beta
            ],
            out_specs=pl.BlockSpec((batch_block, C0, N), lambda b: (b, 0, 0)),
        ),
        compiler_params=pltpu.CompilerParams(
            dimension_semantics=("parallel",)),
    )(qT, key, value, k_w_eff, k_bias, v_w, g2c, b2c)

    return jnp.transpose(out_t, (0, 2, 1))          # back to [B, N, C0]


def _reference(query, key, value, k_w, v_w, g1, b1, g2, b2):
    def ln(x, g, b):
        mu = jnp.mean(x, axis=-1, keepdims=True)
        var = jnp.mean((x - mu) ** 2, axis=-1, keepdims=True)
        return (x - mu) / jnp.sqrt(var + LN_EPS) * g + b

    kn = ln(key, g1, b1)
    qn = ln(query, g2, b2)
    kp = jnp.einsum('bnc,ck->bkn', kn, k_w)
    vp = jnp.einsum('bnc,ck->bnk', value, v_w)
    attn = jnp.einsum('bnc,bcm->bnm', qn, kp)
    attn = jax.nn.softmax(attn, axis=-1)
    return jnp.einsum('bnm,bmc->bnc', attn, vp)


if __name__ == "__main__":
    # Small shapes consistent with the module: query [B, N, in_channel],
    # key/value [B, M, emb_dim].
    B, N, M = 2, 128, 4
    emb_dim, in_channel = 32, 4

    root = jax.random.PRNGKey(0)
    kq, kk, kv, kw1, kw2 = jax.random.split(root, 5)

    query = jax.random.normal(kq, (B, N, in_channel), dtype=jnp.float32)
    key = jax.random.normal(kk, (B, M, emb_dim), dtype=jnp.float32)
    value = jax.random.normal(kv, (B, M, emb_dim), dtype=jnp.float32)

    # Deterministic parameter init mirroring reset_parameters_():
    # trunc_normal(std=0.02) for projection weights, ones/zeros for LayerNorm.
    k_proj_w = 0.02 * jax.random.truncated_normal(
        kw1, -2.0, 2.0, (emb_dim, in_channel), dtype=jnp.float32)
    v_proj_w = 0.02 * jax.random.truncated_normal(
        kw2, -2.0, 2.0, (emb_dim, in_channel), dtype=jnp.float32)
    norm1_g = jnp.ones((1, emb_dim), jnp.float32)
    norm1_b = jnp.zeros((1, emb_dim), jnp.float32)
    norm2_g = jnp.ones((1, in_channel), jnp.float32)
    norm2_b = jnp.zeros((1, in_channel), jnp.float32)

    out = attn_decoder_block(query, key, value, k_proj_w, v_proj_w,
                             norm1_g, norm1_b, norm2_g, norm2_b)
    out = jax.block_until_ready(out)

    ref = _reference(query, key, value, k_proj_w, v_proj_w,
                     norm1_g, norm1_b, norm2_g, norm2_b)
    # Slightly relaxed tolerance: softmax denominator uses the EUP approximate
    # reciprocal (pl.reciprocal(approx=True)).
    np.testing.assert_allclose(np.asarray(out), np.asarray(ref),
                               rtol=2e-3, atol=1e-3)
    print("KERNEL_OK")
</pallas_src>

<mosaic_0001>
module attributes {stable_mosaic.version = 11 : i64} {
  func.func @attn_decoder_kernel(%arg0: i32, %arg1: memref<1x4x128xf32, #tpu.memory_space<vmem>>, %arg2: memref<1x4x32xf32, #tpu.memory_space<vmem>>, %arg3: memref<1x4x32xf32, #tpu.memory_space<vmem>>, %arg4: memref<32x4xf32, #tpu.memory_space<vmem>>, %arg5: memref<1x4xf32, #tpu.memory_space<vmem>>, %arg6: memref<32x4xf32, #tpu.memory_space<vmem>>, %arg7: memref<4x1xf32, #tpu.memory_space<vmem>>, %arg8: memref<4x1xf32, #tpu.memory_space<vmem>>, %arg9: memref<1x4x128xf32, #tpu.memory_space<vmem>>) attributes {dimension_semantics = [#tpu.dimension_semantics<parallel>], iteration_bounds = array<i64: 2>, scalar_prefetch = 0 : i64, scratch_operands = 0 : i64, tpu.core_type = #tpu.core_type<tc>, window_params = [{transform_indices = @transform_0, window_bounds = array<i64: 1, 4, 128>}, {transform_indices = @transform_1, window_bounds = array<i64: 1, 4, 32>}, {transform_indices = @transform_2, window_bounds = array<i64: 1, 4, 32>}, {pipeline_mode = #tpu.pipeline_mode<synchronous>, transform_indices = @transform_3, window_bounds = array<i64: 32, 4>}, {pipeline_mode = #tpu.pipeline_mode<synchronous>, transform_indices = @transform_4, window_bounds = array<i64: 1, 4>}, {pipeline_mode = #tpu.pipeline_mode<synchronous>, transform_indices = @transform_5, window_bounds = array<i64: 32, 4>}, {pipeline_mode = #tpu.pipeline_mode<synchronous>, transform_indices = @transform_6, window_bounds = array<i64: 4, 1>}, {pipeline_mode = #tpu.pipeline_mode<synchronous>, transform_indices = @transform_7, window_bounds = array<i64: 4, 1>}, {transform_indices = @transform_8, window_bounds = array<i64: 1, 4, 128>}]} {
    %c0 = arith.constant 0 : index
    %c0_0 = arith.constant 0 : index
    %c0_1 = arith.constant 0 : index
    %0 = vector.load %arg2[%c0, %c0_0, %c0_1] : memref<1x4x32xf32, #tpu.memory_space<vmem>>, vector<1x4x32xf32>
    %1 = vector.shape_cast %0 : vector<1x4x32xf32> to vector<4x32xf32>
    %cst = arith.constant dense<0.000000e+00> : vector<4xf32>
    %2 = vector.multi_reduction <add>, %1, %cst [1] : vector<4x32xf32> to vector<4xf32>
    %3 = vector.shape_cast %2 : vector<4xf32> to vector<4x1xf32>
    %cst_2 = arith.constant 3.200000e+01 : f32
    %4 = vector.broadcast %cst_2 : f32 to vector<4x1xf32>
    %5 = arith.divf %3, %4 : vector<4x1xf32>
    %6 = vector.broadcast %5 : vector<4x1xf32> to vector<4x32xf32>
    %7 = arith.subf %1, %6 : vector<4x32xf32>
    %8 = arith.mulf %7, %7 : vector<4x32xf32>
    %cst_3 = arith.constant dense<0.000000e+00> : vector<4xf32>
    %9 = vector.multi_reduction <add>, %8, %cst_3 [1] : vector<4x32xf32> to vector<4xf32>
    %10 = vector.shape_cast %9 : vector<4xf32> to vector<4x1xf32>
    %cst_4 = arith.constant 3.200000e+01 : f32
    %11 = vector.broadcast %cst_4 : f32 to vector<4x1xf32>
    %12 = arith.divf %10, %11 : vector<4x1xf32>
    %13 = vector.broadcast %5 : vector<4x1xf32> to vector<4x32xf32>
    %14 = arith.subf %1, %13 : vector<4x32xf32>
    %cst_5 = arith.constant 9.99999974E-6 : f32
    %15 = vector.broadcast %cst_5 : f32 to vector<4x1xf32>
    %16 = arith.addf %12, %15 : vector<4x1xf32>
    %17 = math.rsqrt %16 : vector<4x1xf32>
    %18 = vector.broadcast %17 : vector<4x1xf32> to vector<4x32xf32>
    %19 = arith.mulf %14, %18 : vector<4x32xf32>
    %c0_6 = arith.constant 0 : index
    %c0_7 = arith.constant 0 : index
    %20 = vector.load %arg4[%c0_6, %c0_7] : memref<32x4xf32, #tpu.memory_space<vmem>>, vector<32x4xf32>
    %cst_8 = arith.constant dense<0.000000e+00> : vector<4x4xf32>
    %21 = tpu.matmul %19, %20, %cst_8 {dimension_numbers = #tpu.dot_dimension_numbers<[1], [0], [0], [1], [0, 0, 1, 1], [], []>} : vector<4x32xf32>, vector<32x4xf32>, vector<4x4xf32> -> vector<4x4xf32>
    %c0_9 = arith.constant 0 : index
    %c0_10 = arith.constant 0 : index
    %22 = vector.load %arg5[%c0_9, %c0_10] : memref<1x4xf32, #tpu.memory_space<vmem>>, vector<1x4xf32>
    %23 = vector.broadcast %22 : vector<1x4xf32> to vector<4x4xf32>
    %24 = arith.addf %21, %23 : vector<4x4xf32>
    %c0_11 = arith.constant 0 : index
    %c0_12 = arith.constant 0 : index
    %c0_13 = arith.constant 0 : index
    %25 = vector.load %arg3[%c0_11, %c0_12, %c0_13] : memref<1x4x32xf32, #tpu.memory_space<vmem>>, vector<1x4x32xf32>
    %26 = vector.shape_cast %25 : vector<1x4x32xf32> to vector<4x32xf32>
    %c0_14 = arith.constant 0 : index
    %c0_15 = arith.constant 0 : index
    %27 = vector.load %arg6[%c0_14, %c0_15] : memref<32x4xf32, #tpu.memory_space<vmem>>, vector<32x4xf32>
    %cst_16 = arith.constant dense<0.000000e+00> : vector<4x4xf32>
    %28 = tpu.matmul %26, %27, %cst_16 {dimension_numbers = #tpu.dot_dimension_numbers<[1], [0], [0], [1], [0, 0, 1, 1], [], []>} : vector<4x32xf32>, vector<32x4xf32>, vector<4x4xf32> -> vector<4x4xf32>
    %c0_17 = arith.constant 0 : index
    %c0_18 = arith.constant 0 : index
    %29 = vector.load %arg7[%c0_17, %c0_18] : memref<4x1xf32, #tpu.memory_space<vmem>>, vector<4x1xf32>
    %c0_19 = arith.constant 0 : index
    %c0_20 = arith.constant 0 : index
    %30 = vector.load %arg8[%c0_19, %c0_20] : memref<4x1xf32, #tpu.memory_space<vmem>>, vector<4x1xf32>
    %c0_21 = arith.constant 0 : index
    %c0_22 = arith.constant 0 : index
    %c0_23 = arith.constant 0 : index
    %31 = vector.load %arg1[%c0_21, %c0_22, %c0_23] : memref<1x4x128xf32, #tpu.memory_space<vmem>>, vector<1x4x128xf32>
    %32 = vector.shape_cast %31 : vector<1x4x128xf32> to vector<4x128xf32>
    %cst_24 = arith.constant dense<0.000000e+00> : vector<128xf32>
    %33 = vector.multi_reduction <add>, %32, %cst_24 [0] : vector<4x128xf32> to vector<128xf32>
    %34 = vector.shape_cast %33 : vector<128xf32> to vector<1x128xf32>
    %cst_25 = arith.constant 4.000000e+00 : f32
    %35 = vector.broadcast %cst_25 : f32 to vector<1x128xf32>
    %36 = arith.divf %34, %35 : vector<1x128xf32>
    %37 = vector.broadcast %36 : vector<1x128xf32> to vector<4x128xf32>
    %38 = arith.subf %32, %37 : vector<4x128xf32>
    %39 = arith.mulf %38, %38 : vector<4x128xf32>
    %cst_26 = arith.constant dense<0.000000e+00> : vector<128xf32>
    %40 = vector.multi_reduction <add>, %39, %cst_26 [0] : vector<4x128xf32> to vector<128xf32>
    %41 = vector.shape_cast %40 : vector<128xf32> to vector<1x128xf32>
    %cst_27 = arith.constant 4.000000e+00 : f32
    %42 = vector.broadcast %cst_27 : f32 to vector<1x128xf32>
    %43 = arith.divf %41, %42 : vector<1x128xf32>
    %44 = vector.broadcast %36 : vector<1x128xf32> to vector<4x128xf32>
    %45 = arith.subf %32, %44 : vector<4x128xf32>
    %cst_28 = arith.constant 9.99999974E-6 : f32
    %46 = vector.broadcast %cst_28 : f32 to vector<1x128xf32>
    %47 = arith.addf %43, %46 : vector<1x128xf32>
    %48 = math.rsqrt %47 : vector<1x128xf32>
    %49 = vector.broadcast %48 : vector<1x128xf32> to vector<4x128xf32>
    %50 = arith.mulf %45, %49 : vector<4x128xf32>
    %51 = vector.broadcast %29 : vector<4x1xf32> to vector<4x128xf32>
    %52 = arith.mulf %50, %51 : vector<4x128xf32>
    %53 = vector.broadcast %30 : vector<4x1xf32> to vector<4x128xf32>
    %54 = arith.addf %52, %53 : vector<4x128xf32>
    %cst_29 = arith.constant dense<0.000000e+00> : vector<4x128xf32>
    %55 = tpu.matmul %24, %54, %cst_29 {dimension_numbers = #tpu.dot_dimension_numbers<[1], [0], [0], [1], [0, 0, 1, 1], [], []>} : vector<4x4xf32>, vector<4x128xf32>, vector<4x128xf32> -> vector<4x128xf32>
    %cst_30 = arith.constant dense<0xFF800000> : vector<128xf32>
    %56 = vector.multi_reduction <maximumf>, %55, %cst_30 [0] : vector<4x128xf32> to vector<128xf32>
    %57 = vector.shape_cast %56 : vector<128xf32> to vector<1x128xf32>
    %58 = vector.broadcast %57 : vector<1x128xf32> to vector<4x128xf32>
    %59 = arith.subf %55, %58 : vector<4x128xf32>
    %60 = math.exp %59 : vector<4x128xf32>
    %cst_31 = arith.constant dense<0.000000e+00> : vector<128xf32>
    %61 = vector.multi_reduction <add>, %60, %cst_31 [0] : vector<4x128xf32> to vector<128xf32>
    %62 = vector.shape_cast %61 : vector<128xf32> to vector<1x128xf32>
    %63 = tpu.reciprocal %62 {approx = true} : vector<1x128xf32> -> vector<1x128xf32>
    %64 = vector.broadcast %63 : vector<1x128xf32> to vector<4x128xf32>
    %65 = arith.mulf %60, %64 : vector<4x128xf32>
    %cst_32 = arith.constant dense<0.000000e+00> : vector<4x128xf32>
    %66 = tpu.matmul %28, %65, %cst_32 {dimension_numbers = #tpu.dot_dimension_numbers<[0], [0], [1], [1], [0, 1, 1, 1], [], []>} : vector<4x4xf32>, vector<4x128xf32>, vector<4x128xf32> -> vector<4x128xf32>
    %c0_33 = arith.constant 0 : index
    %c0_34 = arith.constant 0 : index
    %c0_35 = arith.constant 0 : index
    %67 = vector.load %arg9[%c0_33, %c0_34, %c0_35] : memref<1x4x128xf32, #tpu.memory_space<vmem>>, vector<1x4x128xf32>
    %68 = vector.shape_cast %67 : vector<1x4x128xf32> to vector<4x128xf32>
    %69 = vector.shape_cast %66 : vector<4x128xf32> to vector<1x4x128xf32>
    tpu.vector_store %arg9[%c0_33, %c0_34, %c0_35], %69 {strides = array<i32>} : memref<1x4x128xf32, #tpu.memory_space<vmem>>, vector<1x4x128xf32>,
    return
  }
  func.func @transform_0(%arg0: i32) -> (i32, i32, i32) {
    %c0_i32 = arith.constant 0 : i32
    %c0_i32_0 = arith.constant 0 : i32
    %c0_i32_1 = arith.constant 0 : i32
    return %arg0, %c0_i32, %c0_i32_0 : i32, i32, i32
  }
  func.func @transform_1(%arg0: i32) -> (i32, i32, i32) {
    %c0_i32 = arith.constant 0 : i32
    %c0_i32_0 = arith.constant 0 : i32
    %c0_i32_1 = arith.constant 0 : i32
    return %arg0, %c0_i32, %c0_i32_0 : i32, i32, i32
  }
  func.func @transform_2(%arg0: i32) -> (i32, i32, i32) {
    %c0_i32 = arith.constant 0 : i32
    %c0_i32_0 = arith.constant 0 : i32
    %c0_i32_1 = arith.constant 0 : i32
    return %arg0, %c0_i32, %c0_i32_0 : i32, i32, i32
  }
  func.func @transform_3(%arg0: i32) -> (i32, i32) {
    %c0_i32 = arith.constant 0 : i32
    %c0_i32_0 = arith.constant 0 : i32
    %c0_i32_1 = arith.constant 0 : i32
    return %c0_i32, %c0_i32_0 : i32, i32
  }
  func.func @transform_4(%arg0: i32) -> (i32, i32) {
    %c0_i32 = arith.constant 0 : i32
    %c0_i32_0 = arith.constant 0 : i32
    %c0_i32_1 = arith.constant 0 : i32
    return %c0_i32, %c0_i32_0 : i32, i32
  }
  func.func @transform_5(%arg0: i32) -> (i32, i32) {
    %c0_i32 = arith.constant 0 : i32
    %c0_i32_0 = arith.constant 0 : i32
    %c0_i32_1 = arith.constant 0 : i32
    return %c0_i32, %c0_i32_0 : i32, i32
  }
  func.func @transform_6(%arg0: i32) -> (i32, i32) {
    %c0_i32 = arith.constant 0 : i32
    %c0_i32_0 = arith.constant 0 : i32
    %c0_i32_1 = arith.constant 0 : i32
    return %c0_i32, %c0_i32_0 : i32, i32
  }
  func.func @transform_7(%arg0: i32) -> (i32, i32) {
    %c0_i32 = arith.constant 0 : i32
    %c0_i32_0 = arith.constant 0 : i32
    %c0_i32_1 = arith.constant 0 : i32
    return %c0_i32, %c0_i32_0 : i32, i32
  }
  func.func @transform_8(%arg0: i32) -> (i32, i32, i32) {
    %c0_i32 = arith.constant 0 : i32
    %c0_i32_0 = arith.constant 0 : i32
    %c0_i32_1 = arith.constant 0 : i32
    return %arg0, %c0_i32, %c0_i32_0 : i32, i32, i32
  }
}

</mosaic_0001>

<bundles_post_ra>
// kernel: tpu_custom_call.1
= control target key start
LH: loop header
LB: loop body
LE: loop exit
PB: predicated region body
PF: predicated region fallthrough
CT: control target
= control target key end

     0   :  { %13 = vsyncpa [#allocation3], 0  ;;  %s1258_s0 = inlined_call_operand.vmem [shape: f32[2,4,128], index: 0, kind: input, shape index: {}]   ;;  %s1259_s1 = inlined_call_operand.vmem [shape: f32[2,4,32], index: 1, kind: input, shape index: {}]   ;;  %s1260_s2 = inlined_call_operand.vmem [shape: f32[2,4,32], index: 2, kind: input, shape index: {}]   ;;  %s1261_s3 = inlined_call_operand.vmem [shape: f32[32,4], index: 3, kind: input, shape index: {}]   ;;  %s1262_s4 = inlined_call_operand.vmem [shape: f32[1,4], index: 4, kind: input, shape index: {}]   ;;  %s1263_s5 = inlined_call_operand.vmem [shape: f32[32,4], index: 5, kind: input, shape index: {}]   ;;  %s1264_s6 = inlined_call_operand.vmem [shape: f32[4,1], index: 6, kind: input, shape index: {}]   ;;  %s1265_s7 = inlined_call_operand.vmem [shape: f32[4,1], index: 7, kind: input, shape index: {}]   ;;  %s1266_s8 = inlined_call_operand.hbm [shape: f32[2,4,128], index: 8, kind: output, shape index: {}]  }
   0x1   :  { %15 = vsyncpa [#allocation3 + $0x1], 0  ;;  %s1082_s27 = smov 0   ;;  %s1084_s28 = smov 0  }
   0x2   :  { %s1086_s29 = smov 0   ;;  %s1088_s30 = smov 0  }
   0x3 LB: > { %s1103_s9 = sadd.s32 4294967295, %s1031_s30   ;;  %s854_s10 = sadd.s32 4294967294, %s1031_s30   ;;  %s1031_s30 = sphi %s1088_s30, %s1272_s30   ;;  %s1027_s29 = sphi %s1086_s29, %s1271_s29   ;;  %s1023_s28 = sphi %s1084_s28, %s1270_s28   ;;  %s1019_s27 = sphi %s1082_s27, %s1269_s27  }
   0x4   : > { %s1107_s11 = sadd.s32 1, %s1031_s30   ;;  %s211_s12 = sadd.s32 1, %s1027_s29 }
   0x5   : > { %s208_s13 = ssub.s32 %s1031_s30, %s1107_s11  ;;  %p221_p0 = scmp.ne.s32.totalorder %s1027_s29, %s1023_s28 }
   0x6   : > { %p209_p1 = scmp.eq.s32.totalorder %s208_s13, 0  ;;  %p222_p2 = scmp.eq.s32.totalorder %s1103_s9, 1 }
   0x7   : > { %p227_p3 = scmp.ne.s32.totalorder %s1023_s28, %s1019_s27  ;;  %p228_p4 = scmp.eq.s32.totalorder %s854_s10, 1 }
   0x8   : > { %s1118_s14 = scalar_select %p209_p1, %s1027_s29, %s211_s12  }
   0x9   : > { %p1120_p5 = por %p222_p2, %p221_p0  ;;  %p1124_p6 = por %p228_p4, %p227_p3 }
   0xa   : > { %p857_p7 = scmp.ge.s32.totalorder %s1031_s30, 1  ;;  %p282_p8 = scmp.lt.s32.totalorder %s1031_s30, 3 }
   0xc   : > { %p283_p9 = pnand %p857_p7, %p282_p8 }
   0xd   : > { %p323_p10 = scmp.lt.s32.totalorder (!%p283_p9), %s1103_s9, 1  ;;  %s320_s25 = sand.u32 (!%p283_p9), 1, %s1023_s28  }
   0xe   : > { %286 = sbr.rel (%p283_p9) target bundleno = 984 (0x3d8), region = 52  ;;  %s858_s26 = sshll.u32 (!%p283_p9), %s320_s25, 2 }
   0xf   : > { %s322_s10 = scalar_lea.vmem (!%p283_p9), [#allocation2], %s858_s26  ;;  %s870_s13 = sshll.u32 (!%p283_p9), %s1103_s9, 6 }
  0x10   : > { %s1219_s20 = scalar_lea.hbm (!%p283_p9), %s1266_s8, %s870_s13 }
  0x13   : > { %s324_s17 = scalar_select %p323_p10, %s1103_s9, 1  ;;  %vm336_vm0 = vcmask 257024   ;;  %v354_v7 = vld [vmem:[%s1261_s3 + $0x18] sm:$0xff]  ;;  %v1033_v8 = vmov 0.0   ;;  %v353_v9 = vld [vmem:[%s1261_s3 + $0x10] sm:$0xff]  ;;  %vm1034_vm1 = vmmov 0  }
  0x14   : > { %887 = vmatprep.subr.mxu0 %v1033_v8  ;;  %895 = vmatprep.mubr.msk.f32.mxu0 %vm1034_vm1, %v1033_v8  ;;  %v352_v10 = vld [vmem:[%s1261_s3 + $0x8] sm:$0xff]  ;;  %v351_v11 = vld [vmem:[%s1261_s3] sm:$0xff]  ;;  %v440_v13 = vld [vmem:[%s1263_s5 + $0x18] sm:$0xff]  ;;  %v1035_v14 = vmov 0   ;;  %vm362_vm2 = vcmask 261120   ;;  %vm517_vm3 = vcmask 1043456  }
  0x15   : > { %s1132_s18 = sshll.u32 %s324_s17, 2  ;;  %888 = vmatpush3.msra.mxu0 %v354_v7  ;;  %898 = vmatprep.subr.mxu1 %v1033_v8  ;;  %v514_v12 = vld [vmem:[%s1264_s6] sm:$0xf]  ;;  %v439_v15 = vld [vmem:[%s1263_s5 + $0x10] sm:$0xff]  ;;  %v438_v16 = vld [vmem:[%s1263_s5 + $0x8] sm:$0xff]  ;;  %vm552_vm4 = vcmask 31744  }
  0x16   : > { %s330_s21 = scalar_lea.vmem %s1259_s1, %s1132_s18  ;;  %889 = vmatprep.subr.mxu0 %v1033_v8  ;;  %906 = vmatprep.mubr.msk.f32.mxu1 %vm1034_vm1, %v1033_v8  ;;  %s334_s12 = scalar_lea.vmem %s1260_s2, %s1132_s18  ;;  %v515_v17 = vld [vmem:[%s1265_s7] sm:$0xf] }
  0x17   : > { %v335_v0 = vld [vmem:[%s330_s21] sm:$0xf]  ;;  %890 = vmatpush3.msra.mxu0 %v353_v9  ;;  %961 = vset.pattern.permute.xlu1 %v1035_v14  ;;  %s326_s23 = scalar_lea.vmem %s1258_s0, %s1132_s18  ;;  %s758_s21 = scalar_lea.sflag [#allocation3], %s320_s25 }
  0x18   : > { %v337_v1 = vsel %vm336_vm0, %v335_v0, 0.0  ;;  %891 = vmatprep.subr.mxu0 %v1033_v8  ;;  %899 = vmatpush3.msra.mxu1 %v440_v13  ;;  %v437_v18 = vld [vmem:[%s1263_s5] sm:$0xff]  ;;  %s1036_s9 = smov [#allocation2]  }
  0x19   : > { %338 = vadd.xlane.f32.xlu0 %v337_v1  ;;  %892 = vmatpush3.msra.mxu0 %v352_v10  ;;  %v436_v19 = vld [vmem:[%s334_s12] sm:$0xf]  ;;  %s771_s12 = sshll.u32 %s322_s10, 4  ;;  %s1214_s12 = int_to_ptr.vmem [resolvable:$true] %s771_s12 }
  0x1a   : > { %893 = vmatprep.subr.mxu0 %v1033_v8  ;;  %542 = vperm.xlu1 %961, %v514_v12   ;;  %v516_v20 = vld [vmem:[%s326_s23] sm:$0xf]  ;;  %s971_s22 = scalar_lea.vmem %s1214_s12, 64  ;;  %s975_s23 = sshll.u32 %s1036_s9, 4  ;;  %s976_s23 = int_to_ptr.vmem [resolvable:$false] %s975_s23 }
  0x1b   : > { %894 = vmatpush3.msra.mxu0 %v351_v11  ;;  %900 = vmatprep.subr.mxu1 %v1033_v8  ;;  %v518_v21 = vsel %vm517_vm3, %v516_v20, 0.0  ;;  %v862_v53 = vld [vmem:[%s1262_s4] ss:$0 sm:$0xff]  ;;  %p972_p11 = scmp.ne.s32.totalorder %s1214_s12, %s971_s22  ;;  %s977_s18 = scalar_lea.vmem %s976_s23, 128 }
  0x1c   : > { %909 = vmatprep.subr.mxu0 %v1033_v8  ;;  %901 = vmatpush3.msra.mxu1 %v439_v15  ;;  %v519_v22 = vrot.slane %v518_v21, 4  ;;  %p978_p0 = scmp.lt.s32.totalorder %s1214_s12, %s976_s23  ;;  %p979_p1 = scmp.lt.s32.totalorder %s977_s18, %s971_s22 }
  0x1d   : > { %902 = vmatprep.subr.mxu1 %v1033_v8  ;;  %p973_p12 = pnand %p972_p11, %p1120_p5 }
  0x1e   : > { %903 = vmatpush3.msra.mxu1 %v438_v16  ;;  %548 = vperm.xlu1 %961, %v515_v17   ;;  %v520_v23 = vadd.f32 %v519_v22, %v518_v21  ;;  %p980_p2 = por %p979_p1, %p978_p0 }
  0x1f   : > { %904 = vmatprep.subr.mxu1 %v1033_v8  ;;  %p974_p13 = pneg %p973_p12 }
  0x20   : > { %905 = vmatpush3.msra.mxu1 %v437_v18  ;;  %v521_v24 = vrot.slane %v520_v23, 2 }
  0x21   : > { %907 = vmatmul.mubr.msk.f32.vlgmr.msra.gmra.mxu1 %vm362_vm2, %v436_v19  ;;  %914 = vmatprep.subr.mxu1 %v1033_v8  ;;  %p981_p3 = pnand %p980_p2, %p974_p13 }
  0x22   : > { %916 = vmatprep.mubr.msk.f32.mxu1 %vm1034_vm1, %v1033_v8  ;;  %v522_v25 = vadd.f32 %v521_v24, %v520_v23 }
  0x24   : > { %v523_v26 = vrot.slane %v522_v25, 1 }
  0x26   : > { %v524_v27 = vadd.f32 %v523_v26, %v522_v25 }
  0x28   : > { %v526_v28 = vmul.f32 0.25, %v524_v27 }
  0x2a   : > { %v527_v29 = vsub.f32 %v516_v20, %v526_v28 }
  0x2c   : > { %v528_v30 = vmul.f32 %v527_v29, %v527_v29 }
  0x2e   : > { %v529_v31 = vsel %vm517_vm3, %v528_v30, 0.0 }
  0x2f   : > { %v530_v32 = vrot.slane %v529_v31, 4 }
  0x31   : > { %v531_v33 = vadd.f32 %v530_v32, %v529_v31 }
  0x33   : > { %v532_v34 = vrot.slane %v531_v33, 2 }
  0x35   : > { %v533_v35 = vadd.f32 %v532_v34, %v531_v33 }
  0x37   : > { %v534_v36 = vrot.slane %v533_v35, 1 }
  0x39   : > { %v535_v37 = vadd.f32 %v534_v36, %v533_v35 }
  0x3b   : > { %v536_v38 = vmul.f32 0.25, %v535_v37 }
  0x3d   : > { %v537_v39 = vadd.f32 1e-05, %v536_v38 }
  0x3f   : > { %963 = vrsqrt.f32 %v537_v39 }
  0x4c   : > { %v964_v43 = vpop.eup %963 }
  0x4d   : > { %v539_v44 = vmul.f32 %v964_v43, %v527_v29 }
  0x95   : > { %v543_v46 = vpop.permute.xlu1 %542 }
  0x96   : > { %v545_v48 = vmul.f32 %v543_v46, %v539_v44 }
  0x99   : > { %v549_v49 = vpop.permute.xlu1 %548 }
  0x9a   : > { %v551_v50 = vadd.f32 %v549_v49, %v545_v48 }
  0xa2   : > { %v339_v2 = vpop.xlane.xlu0 %338 }
  0xa3   : > { %v341_v3 = vmul.f32 0.03125, %v339_v2 }
  0xa5   : > { %v1138_v4 = vsub.f32 %v335_v0, %v341_v3 }
  0xa7   : > { %v343_v5 = vmul.f32 %v1138_v4, %v1138_v4 }
  0xa9   : > { %v344_v6 = vsel %vm336_vm0, %v343_v5, 0.0 }
  0xaa   : > { %345 = vadd.xlane.f32.xlu0 %v344_v6 }
  0xe1   : > { %v510_v51 = vpop.f32.mrf.mxu1 }
  0xe2   : > { %648 = vxpose.xlu0.b32.start.end [1/1] (short) (narrow) %v510_v51, 8 }
  0xe3   : > { %v908_v52 = vpop.f32.mrf.mxu1 }
 0x10b   : > { %962 = vset.pattern.permute.xlu0 %v1035_v14 }
 0x133   : > { %v346_v40 = vpop.xlane.xlu0 %345 }
 0x134   : > { %v347_v41 = vmul.f32 0.03125, %v346_v40 }
 0x136   : > { %v348_v42 = vadd.f32 1e-05, %v347_v41 }
 0x138   : > { %965 = vrsqrt.f32 %v348_v42 }
 0x145   : > { %v966_v45 = vpop.eup %965 }
 0x146   : > { %v350_v47 = vmul.f32 %v966_v45, %v1138_v4 }
 0x148   : > { %896 = vmatmul.mubr.msk.f32.vlgmr.msra.gmra.mxu0 %vm362_vm2, %v350_v47 }
 0x149   : > { %911 = vmatprep.mubr.msk.f32.mxu0 %vm1034_vm1, %v1033_v8  ;;  %910 = vmatpush3.msk.msra.mxu0 %vm517_vm3, %v551_v50 }
 0x15e   : > { %v664_v14 = vpop.trf.xlu0 }
 0x208   : > { %v432_v54 = vpop.f32.mrf.mxu0 }
 0x209   : > { %v433_v55 = vadd.f32 %v862_v53, %v432_v54 }
 0x20a   : > { %v897_v56 = vpop.f32.mrf.mxu0 }
 0x20b   : > { %912 = vmatmul.mubr.msk.f32.vlgmr.msra.gmra.mxu0 %vm552_vm4, %v433_v55 }
 0x2cb   : > { %v625_v57 = vpop.f32.mrf.mxu0 }
 0x2cc   : > { %v629_v58 = vsel %vm517_vm3, %v625_v57, -inf }
 0x2cd   : > { %v630_v59 = vrot.slane %v629_v58, 4  ;;  %v913_v60 = vpop.f32.mrf.mxu0 }
 0x2cf   : > { %v631_v61 = vmax.f32 %v629_v58, %v630_v59 }
 0x2d1   : > { %v632_v62 = vrot.slane %v631_v61, 2 }
 0x2d3   : > { %v633_v63 = vmax.f32 %v631_v61, %v632_v62 }
 0x2d5   : > { %v634_v0 = vrot.slane %v633_v63, 1 }
 0x2d7   : > { %v635_v1 = vmax.f32 %v633_v63, %v634_v0 }
 0x2d9   : > { %v636_v2 = vsub.f32 %v625_v57, %v635_v1 }
 0x2db   : > { %v637_v3 = vmul.f32 1.442695, %v636_v2 }
 0x2dd   : > { %967 = vpow2.f32 %v637_v3 }
 0x2ea   : > { %v968_v4 = vpop.eup %967 }
 0x2eb   : > { %v639_v5 = vsel %vm517_vm3, %v968_v4, 0.0 }
 0x2ec   : > { %v640_v6 = vrot.slane %v639_v5, 4 }
 0x2ee   : > { %v641_v7 = vadd.f32 %v640_v6, %v639_v5 }
 0x2f0   : > { %v642_v8 = vrot.slane %v641_v7, 2 }
 0x2f2   : > { %v643_v9 = vadd.f32 %v642_v8, %v641_v7 }
 0x2f4   : > { %v644_v10 = vrot.slane %v643_v9, 1 }
 0x2f6   : > { %v645_v11 = vadd.f32 %v644_v10, %v643_v9 }
 0x2f8   : > { %969 = vrcp.f32 %v645_v11 }
 0x305   : > { %v970_v12 = vpop.eup %969 }
 0x306   : > { %v647_v13 = vmul.f32 %v970_v12, %v968_v4 }
 0x308   : > { %915 = vmatpush3.msk.msra.mxu1 %vm517_vm3, %v647_v13 }
 0x309   : > { %917 = vmatmul.mubr.msk.f32.vlgmr.msra.gmra.mxu1 %vm552_vm4, %v664_v14 }
 0x3c9   : > { %v752_v15 = vpop.f32.mrf.mxu1 }
 0x3ca   : > { %756 = vst [vmem:[%s322_s10] sm:$0xf] %v752_v15 }
 0x3cb   : > { %v918_v16 = vpop.f32.mrf.mxu1 }
 0x3cc   : > { %984 = shalt.err (!%p981_p3)
}
 0x3cd   : > { %s985_s24 = scalar_lea.hbm %s1219_s20, 64  ;;  %s989_s10 = scalar_lea.hbm %s1266_s8, 128 }
 0x3ce   : > { %p986_p4 = scmp.ne.s32.totalorder %s1219_s20, %s985_s24  ;;  %p990_p9 = scmp.lt.s32.totalorder %s1219_s20, %s1266_s8 }
 0x3cf   : > { %p991_p10 = scmp.lt.s32.totalorder %s989_s10, %s985_s24 }
 0x3d0   : > { %p987_p7 = pnand %p986_p4, %p1120_p5 }
 0x3d1   : > { %p992_p11 = por %p991_p10, %p990_p9 }
 0x3d2   : > { %p988_p8 = pneg %p987_p7 }
 0x3d4   : > { %p993_p12 = pnand %p992_p11, %p988_p8 }
 0x3d6   : > { %996 = shalt.err (!%p993_p12)
}
 0x3d7   : > { %919 = dma.vmem_to_hbm [thread:$0]  (%p1120_p5), %s1214_s12, 64, %s1219_s20, %s758_s21  }
 0x3d8 PF: > { %p925_p13 = scmp.ge.s32.totalorder %s1031_s30, 2  ;;  %s783_s19 = sand.u32 1, %s1019_s27  }
 0x3d9   : > { %s784_s22 = scalar_lea.sflag [#allocation3], %s783_s19 }
 0x3da   : > { %p922_p0 = pnand %p925_p13, %p1124_p6 }
 0x3dc   : > { %p923_p1 = pneg %p922_p0 }
 0x3de   : > { %1014 = dma.done.wait (%p923_p1), %s784_s22, 64  }
 0x3df   : > { %1016 = vsyncadd (%p923_p1), %s784_s22, 4294967232  ;;  %p18_p2 = scmp.ge.s32.totalorder %s1107_s11, 4   ;;  %s1269_s27 = smov %s1023_s28 }
 0x3e0   : > { %s1270_s28 = smov %s1027_s29  ;;  %s1271_s29 = smov %s1118_s14 }
 0x3e1   : > { %s1272_s30 = smov %s1107_s11  ;;  %20 = sbr.rel (!%p18_p2) target bundleno = 3 (0x3), region = 93 }
 0x3e6   :  { %789 = vsyncpa [#allocation3], 1 }
 0x3e7   :  { %791 = vsyncpa [#allocation3 + $0x1], 1 }

</bundles_post_ra>
